<compile_context>
chip_gen: v6e
topology: v6e:2x2x1
jax: 0.10.0
libtpu: 0.0.40
codegen_flags: <defaults>
</compile_context>

<pallas_src>
import functools

import jax
import jax.numpy as jnp
from jax.experimental import pallas as pl
from jax.experimental.pallas import tpu as pltpu

_LANE = 128
_SUBLANE = 8


def _round_up(n, m):
    return ((n + m - 1) // m) * m


def _pad2d(a, rows, cols):
    r, c = a.shape
    return jnp.pad(a, ((0, rows - r), (0, cols - c)))


# ----------------------------------------------------------------------------
# Kernel bodies.
# ----------------------------------------------------------------------------
def _mlp_compute(x_in, w_ref, b_ref, sw_ref, sb_ref, n_layers, n_skip):
    """Whole (padded) MLP on one batch tile held in vregs.

    x_in: (bm, D) zero-padded activations.  Weights bf16, biases f32.
    Returns the f32 (bm, D) result (last layer + sum of ReLU'd skip branches).
    """
    # TODO(synk): for very deep uniform-width MLPs switch this static unroll
    # to lax.fori_loop over the stacked weight ref to bound vreg live ranges.
    x = x_in.astype(jnp.bfloat16)
    acc = None
    h = None
    for i in range(n_layers):
        if i < n_skip:
            s = jnp.dot(x, sw_ref[i], preferred_element_type=jnp.float32)
            s = jnp.maximum(s + sb_ref[i], 0.0)
            acc = s if acc is None else acc + s
        h = jnp.dot(x, w_ref[i], preferred_element_type=jnp.float32)
        h = jnp.maximum(h + b_ref[i], 0.0)
        x = h.astype(jnp.bfloat16)
    return h if acc is None else h + acc


def _mlp_kernel_grid(n_layers, n_skip, *refs):
    # refs = x, W, B, [SW, SB], out    (x already padded by the wrapper)
    x_ref, w_ref, b_ref = refs[0], refs[1], refs[2]
    sw_ref, sb_ref = (refs[3], refs[4]) if n_skip else (None, None)
    out_ref = refs[-1]
    res = _mlp_compute(x_ref[...], w_ref, b_ref, sw_ref, sb_ref,
                       n_layers, n_skip)
    out_ref[...] = res.astype(out_ref.dtype)


def _mlp_kernel_small(n_layers, n_skip, B, D_in, *refs):
    # refs = x, W, B, [SW, SB], out, xpad_scratch.
    # x is the *unpadded* input; padding to the (8,128)-friendly shape is done
    # here via a zeroed VMEM scratch (no separate XLA pad op per call).
    x_ref, w_ref, b_ref = refs[0], refs[1], refs[2]
    sw_ref, sb_ref = (refs[3], refs[4]) if n_skip else (None, None)
    out_ref, xpad_ref = refs[-2], refs[-1]

    xpad_ref[...] = jnp.zeros_like(xpad_ref)
    xpad_ref[:B, :D_in] = x_ref[...].astype(xpad_ref.dtype)
    res = _mlp_compute(xpad_ref[...], w_ref, b_ref, sw_ref, sb_ref,
                       n_layers, n_skip)
    out_ref[...] = res.astype(out_ref.dtype)


# ----------------------------------------------------------------------------
# Parameter construction (mimics torch.nn.Linear init; weights stored
# transposed as (d_in, d_out)).  Padded/stacked copies are built ONCE.
# Zero-padding is exact: ReLU(0)=0 and padded weight rows/cols and biases are
# zero, so padded lanes stay zero through every layer.
# ----------------------------------------------------------------------------
def init_linear(key, d_in, d_out, dtype=jnp.float32):
    kw, kb = jax.random.split(key)
    bound = 1.0 / jnp.sqrt(jnp.asarray(d_in, dtype))
    w_t = jax.random.uniform(kw, (d_in, d_out), dtype, -bound, bound)
    b = jax.random.uniform(kb, (d_out,), dtype, -bound, bound)
    return w_t, b


def init_mlp_params(key, dims, skip_connection, dtype=jnp.float32):
    layers, skips = [], []
    keys = jax.random.split(key, 2 * len(dims))
    for h, (i, j) in enumerate(dims):
        layers.append(init_linear(keys[2 * h], i, j, dtype))
        if skip_connection and len(dims) > 1 and h < len(dims) - 1:
            skips.append(init_linear(keys[2 * h + 1], i, dims[-1][-1], dtype))
    has_skip = skip_connection and len(skips) > 0

    # One padded width for every layer keeps the stacked-weight layout uniform.
    all_dims = [d for dd in dims for d in dd]
    d_max = _round_up(max(all_dims), _LANE)

    def stack(lins):
        w = jnp.stack([_pad2d(wt, d_max, d_max) for wt, _ in lins])
        b = jnp.stack([_pad2d(bb.reshape(1, -1), 1, d_max) for _, bb in lins])
        return w.astype(jnp.bfloat16), b.astype(jnp.float32)

    w_stack, b_stack = stack(layers)
    sw_stack, sb_stack = stack(skips) if has_skip else (None, None)

    return {
        "layers": layers,
        "skip_layers": skips if has_skip else None,
        "skip_connection": has_skip,
        "d_max": d_max,
        "w_stack": w_stack,
        "b_stack": b_stack,
        "sw_stack": sw_stack,
        "sb_stack": sb_stack,
    }


# ----------------------------------------------------------------------------
# Forward wrapper: one fused pallas_call, then slice back to logical shape.
# ----------------------------------------------------------------------------
def mlp_forward(params, x, batch_tile=256):
    B, D_in = x.shape
    d_max = params["d_max"]
    w_stack, b_stack = params["w_stack"], params["b_stack"]
    sw_stack, sb_stack = params["sw_stack"], params["sb_stack"]
    n_layers = w_stack.shape[0]
    n_skip = sw_stack.shape[0] if params["skip_connection"] else 0
    d_out = params["layers"][-1][0].shape[1]

    weight_inputs = [w_stack, b_stack]
    if n_skip:
        weight_inputs += [sw_stack, sb_stack]

    use_grid = B >= 2 * batch_tile
    bm = batch_tile if use_grid else _round_up(B, _SUBLANE)

    # Explicit VMEM budget: whole bf16 weight set + activations, x2 for
    # double-buffering, floor 4 MiB, capped safely below every chip's limit.
    w_bytes = sum(int(a.size) * a.dtype.itemsize for a in weight_inputs)
    act_bytes = 3 * bm * d_max * 4
    vmem_limit = int(min(max(2 * (w_bytes + act_bytes), 4 * 2**20), 32 * 2**20))

    if use_grid:
        # Batch-tiled path: a real "parallel" grid axis (shards across v7x's
        # two TensorCores).  Weight index_maps are constant so the stacked
        # weights stay VMEM-resident instead of being re-DMA'd per tile.
        b_pad = _round_up(B, bm)
        x_pad = _pad2d(x, b_pad, d_max)
        in_specs = [pl.BlockSpec((bm, d_max), lambda i: (i, 0)),
                    pl.BlockSpec(w_stack.shape, lambda i: (0, 0, 0)),
                    pl.BlockSpec(b_stack.shape, lambda i: (0, 0, 0))]
        if n_skip:
            in_specs += [pl.BlockSpec(sw_stack.shape, lambda i: (0, 0, 0)),
                         pl.BlockSpec(sb_stack.shape, lambda i: (0, 0, 0))]
        out = pl.pallas_call(
            functools.partial(_mlp_kernel_grid, n_layers, n_skip),
            out_shape=jax.ShapeDtypeStruct((b_pad, d_max), x.dtype),
            grid=(b_pad // bm,),
            in_specs=in_specs,
            out_specs=pl.BlockSpec((bm, d_max), lambda i: (i, 0)),
            compiler_params=pltpu.CompilerParams(
                dimension_semantics=("parallel",),
                vmem_limit_bytes=vmem_limit),
        )(x_pad, *weight_inputs)
    else:
        # Small-batch path: no grid (no per-step machinery); x is passed
        # unpadded and zero-padded inside the kernel via a VMEM scratch.
        b_pad = bm
        vmem = pl.BlockSpec(memory_space=pltpu.MemorySpace.VMEM)
        out = pl.pallas_call(
            functools.partial(_mlp_kernel_small, n_layers, n_skip, B, D_in),
            out_shape=jax.ShapeDtypeStruct((b_pad, d_max), x.dtype),
            in_specs=[vmem] * (1 + len(weight_inputs)),
            out_specs=vmem,
            scratch_shapes=[pltpu.VMEM((b_pad, d_max), jnp.float32)],
            compiler_params=pltpu.CompilerParams(vmem_limit_bytes=vmem_limit),
        )(x, *weight_inputs)

    return out[:B, :d_out]


# ----------------------------------------------------------------------------
# References for verification.
# ----------------------------------------------------------------------------
def mlp_forward_ref_f32(params, x):
    """Pure-f32 reference mirroring the PyTorch module exactly."""
    layers = params["layers"]
    skips = params["skip_layers"]
    has_skip = params["skip_connection"]
    xs_skip = []
    for i, (w, b) in enumerate(layers):
        if has_skip and i < len(skips):
            sw, sb = skips[i]
            xs_skip.append(jnp.maximum(x @ sw + sb, 0.0))
        x = jnp.maximum(x @ w + b, 0.0)
    if has_skip:
        x = jnp.sum(jnp.stack([x, *xs_skip], axis=0), axis=0)
    return x


def mlp_forward_ref_bf16(params, x):
    """Reference matching the kernel numerics (bf16 operands, f32 accum)."""
    layers = params["layers"]
    skips = params["skip_layers"]
    has_skip = params["skip_connection"]
    xb = x.astype(jnp.bfloat16)
    acc = None
    h = None
    for i, (w, b) in enumerate(layers):
        if has_skip and i < len(skips):
            sw, sb = skips[i]
            s = jnp.dot(xb, sw.astype(jnp.bfloat16),
                        preferred_element_type=jnp.float32) + sb
            s = jnp.maximum(s, 0.0)
            acc = s if acc is None else acc + s
        h = jnp.dot(xb, w.astype(jnp.bfloat16),
                    preferred_element_type=jnp.float32) + b
        h = jnp.maximum(h, 0.0)
        xb = h.astype(jnp.bfloat16)
    return h if acc is None else h + acc


if __name__ == "__main__":
    key = jax.random.PRNGKey(0)
    k_param, k_x, k_xl = jax.random.split(key, 3)

    # MLP(16 -> 32 -> 32 -> 8) with skip connections, batch = 4
    dims = [(16, 32), (32, 32), (32, 8)]
    batch = 4

    params = init_mlp_params(k_param, dims, skip_connection=True)
    x = jax.random.normal(k_x, (batch, dims[0][0]), jnp.float32)

    # Tiny batch -> grid-less fused kernel path.
    out = jax.block_until_ready(mlp_forward(params, x))
    assert out.shape == (batch, dims[-1][-1])
    ref16 = mlp_forward_ref_bf16(params, x)
    ref32 = mlp_forward_ref_f32(params, x)
    assert jnp.allclose(out, ref16, atol=5e-3, rtol=5e-3), (
        float(jnp.max(jnp.abs(out - ref16))))
    # bf16 weights => loose tolerance against the pure-f32 reference.
    assert jnp.allclose(out, ref32, atol=1e-1, rtol=1e-1)

    # No-skip configuration through the same fused kernel.
    params_ns = init_mlp_params(k_param, dims, skip_connection=False)
    out_ns = jax.block_until_ready(mlp_forward(params_ns, x))
    assert jnp.allclose(out_ns, mlp_forward_ref_bf16(params_ns, x),
                        atol=5e-3, rtol=5e-3)

    # Larger batch -> batch-tiled "parallel" grid path (2 tiles of 256).
    xl = jax.random.normal(k_xl, (512, dims[0][0]), jnp.float32)
    out_l = jax.block_until_ready(mlp_forward(params, xl, batch_tile=256))
    assert out_l.shape == (512, dims[-1][-1])
    assert jnp.allclose(out_l, mlp_forward_ref_bf16(params, xl),
                        atol=5e-3, rtol=5e-3)

    print("KERNEL_OK")
</pallas_src>

<mosaic_0001>
module attributes {stable_mosaic.version = 11 : i64} {
  func.func @_mlp_kernel_small(%arg0: memref<4x16xf32, #tpu.memory_space<vmem>>, %arg1: memref<3x128x128xbf16, #tpu.memory_space<vmem>>, %arg2: memref<3x1x128xf32, #tpu.memory_space<vmem>>, %arg3: memref<2x128x128xbf16, #tpu.memory_space<vmem>>, %arg4: memref<2x1x128xf32, #tpu.memory_space<vmem>>, %arg5: memref<8x128xf32, #tpu.memory_space<vmem>>, %arg6: memref<8x128xf32, #tpu.memory_space<vmem>>) attributes {dimension_semantics = [], scalar_prefetch = 0 : i64, scratch_operands = 1 : i64, tpu.core_type = #tpu.core_type<tc>} {
    %cst = arith.constant 0.000000e+00 : f32
    %0 = vector.broadcast %cst : f32 to vector<8x128xf32>
    %c0 = arith.constant 0 : index
    %c0_0 = arith.constant 0 : index
    %1 = vector.load %arg6[%c0, %c0_0] : memref<8x128xf32, #tpu.memory_space<vmem>>, vector<8x128xf32>
    tpu.vector_store %arg6[%c0, %c0_0], %0 {strides = array<i32>} : memref<8x128xf32, #tpu.memory_space<vmem>>, vector<8x128xf32>,
    %c0_1 = arith.constant 0 : index
    %c0_2 = arith.constant 0 : index
    %2 = vector.load %arg0[%c0_1, %c0_2] : memref<4x16xf32, #tpu.memory_space<vmem>>, vector<4x16xf32>
    %c0_3 = arith.constant 0 : index
    %c0_4 = arith.constant 0 : index
    %3 = vector.load %arg6[%c0_3, %c0_4] : memref<8x128xf32, #tpu.memory_space<vmem>>, vector<4x16xf32>
    tpu.vector_store %arg6[%c0_3, %c0_4], %2 {strides = array<i32>} : memref<8x128xf32, #tpu.memory_space<vmem>>, vector<4x16xf32>,
    %c0_5 = arith.constant 0 : index
    %c0_6 = arith.constant 0 : index
    %4 = vector.load %arg6[%c0_5, %c0_6] : memref<8x128xf32, #tpu.memory_space<vmem>>, vector<8x128xf32>
    %5 = arith.truncf %4 : vector<8x128xf32> to vector<8x128xbf16>
    %c0_7 = arith.constant 0 : index
    %c0_8 = arith.constant 0 : index
    %c0_9 = arith.constant 0 : index
    %6 = vector.load %arg3[%c0_7, %c0_8, %c0_9] : memref<2x128x128xbf16, #tpu.memory_space<vmem>>, vector<1x128x128xbf16>
    %7 = vector.shape_cast %6 : vector<1x128x128xbf16> to vector<128x128xbf16>
    %cst_10 = arith.constant dense<0.000000e+00> : vector<8x128xf32>
    %8 = tpu.matmul %5, %7, %cst_10 {dimension_numbers = #tpu.dot_dimension_numbers<[1], [0], [0], [1], [0, 0, 1, 1], [], []>} : vector<8x128xbf16>, vector<128x128xbf16>, vector<8x128xf32> -> vector<8x128xf32>
    %c0_11 = arith.constant 0 : index
    %c0_12 = arith.constant 0 : index
    %c0_13 = arith.constant 0 : index
    %9 = vector.load %arg4[%c0_11, %c0_12, %c0_13] : memref<2x1x128xf32, #tpu.memory_space<vmem>>, vector<1x1x128xf32>
    %10 = vector.shape_cast %9 : vector<1x1x128xf32> to vector<1x128xf32>
    %11 = vector.broadcast %10 : vector<1x128xf32> to vector<8x128xf32>
    %12 = arith.addf %8, %11 : vector<8x128xf32>
    %cst_14 = arith.constant 0.000000e+00 : f32
    %13 = vector.broadcast %cst_14 : f32 to vector<8x128xf32>
    %14 = arith.maximumf %12, %13 : vector<8x128xf32>
    %c0_15 = arith.constant 0 : index
    %c0_16 = arith.constant 0 : index
    %c0_17 = arith.constant 0 : index
    %15 = vector.load %arg1[%c0_15, %c0_16, %c0_17] : memref<3x128x128xbf16, #tpu.memory_space<vmem>>, vector<1x128x128xbf16>
    %16 = vector.shape_cast %15 : vector<1x128x128xbf16> to vector<128x128xbf16>
    %cst_18 = arith.constant dense<0.000000e+00> : vector<8x128xf32>
    %17 = tpu.matmul %5, %16, %cst_18 {dimension_numbers = #tpu.dot_dimension_numbers<[1], [0], [0], [1], [0, 0, 1, 1], [], []>} : vector<8x128xbf16>, vector<128x128xbf16>, vector<8x128xf32> -> vector<8x128xf32>
    %c0_19 = arith.constant 0 : index
    %c0_20 = arith.constant 0 : index
    %c0_21 = arith.constant 0 : index
    %18 = vector.load %arg2[%c0_19, %c0_20, %c0_21] : memref<3x1x128xf32, #tpu.memory_space<vmem>>, vector<1x1x128xf32>
    %19 = vector.shape_cast %18 : vector<1x1x128xf32> to vector<1x128xf32>
    %20 = vector.broadcast %19 : vector<1x128xf32> to vector<8x128xf32>
    %21 = arith.addf %17, %20 : vector<8x128xf32>
    %cst_22 = arith.constant 0.000000e+00 : f32
    %22 = vector.broadcast %cst_22 : f32 to vector<8x128xf32>
    %23 = arith.maximumf %21, %22 : vector<8x128xf32>
    %24 = arith.truncf %23 : vector<8x128xf32> to vector<8x128xbf16>
    %c1 = arith.constant 1 : index
    %c0_23 = arith.constant 0 : index
    %c0_24 = arith.constant 0 : index
    %25 = vector.load %arg3[%c1, %c0_23, %c0_24] : memref<2x128x128xbf16, #tpu.memory_space<vmem>>, vector<1x128x128xbf16>
    %26 = vector.shape_cast %25 : vector<1x128x128xbf16> to vector<128x128xbf16>
    %cst_25 = arith.constant dense<0.000000e+00> : vector<8x128xf32>
    %27 = tpu.matmul %24, %26, %cst_25 {dimension_numbers = #tpu.dot_dimension_numbers<[1], [0], [0], [1], [0, 0, 1, 1], [], []>} : vector<8x128xbf16>, vector<128x128xbf16>, vector<8x128xf32> -> vector<8x128xf32>
    %c1_26 = arith.constant 1 : index
    %c0_27 = arith.constant 0 : index
    %c0_28 = arith.constant 0 : index
    %28 = vector.load %arg4[%c1_26, %c0_27, %c0_28] : memref<2x1x128xf32, #tpu.memory_space<vmem>>, vector<1x1x128xf32>
    %29 = vector.shape_cast %28 : vector<1x1x128xf32> to vector<1x128xf32>
    %30 = vector.broadcast %29 : vector<1x128xf32> to vector<8x128xf32>
    %31 = arith.addf %27, %30 : vector<8x128xf32>
    %cst_29 = arith.constant 0.000000e+00 : f32
    %32 = vector.broadcast %cst_29 : f32 to vector<8x128xf32>
    %33 = arith.maximumf %31, %32 : vector<8x128xf32>
    %34 = arith.addf %14, %33 : vector<8x128xf32>
    %c1_30 = arith.constant 1 : index
    %c0_31 = arith.constant 0 : index
    %c0_32 = arith.constant 0 : index
    %35 = vector.load %arg1[%c1_30, %c0_31, %c0_32] : memref<3x128x128xbf16, #tpu.memory_space<vmem>>, vector<1x128x128xbf16>
    %36 = vector.shape_cast %35 : vector<1x128x128xbf16> to vector<128x128xbf16>
    %cst_33 = arith.constant dense<0.000000e+00> : vector<8x128xf32>
    %37 = tpu.matmul %24, %36, %cst_33 {dimension_numbers = #tpu.dot_dimension_numbers<[1], [0], [0], [1], [0, 0, 1, 1], [], []>} : vector<8x128xbf16>, vector<128x128xbf16>, vector<8x128xf32> -> vector<8x128xf32>
    %c1_34 = arith.constant 1 : index
    %c0_35 = arith.constant 0 : index
    %c0_36 = arith.constant 0 : index
    %38 = vector.load %arg2[%c1_34, %c0_35, %c0_36] : memref<3x1x128xf32, #tpu.memory_space<vmem>>, vector<1x1x128xf32>
    %39 = vector.shape_cast %38 : vector<1x1x128xf32> to vector<1x128xf32>
    %40 = vector.broadcast %39 : vector<1x128xf32> to vector<8x128xf32>
    %41 = arith.addf %37, %40 : vector<8x128xf32>
    %cst_37 = arith.constant 0.000000e+00 : f32
    %42 = vector.broadcast %cst_37 : f32 to vector<8x128xf32>
    %43 = arith.maximumf %41, %42 : vector<8x128xf32>
    %44 = arith.truncf %43 : vector<8x128xf32> to vector<8x128xbf16>
    %c2 = arith.constant 2 : index
    %c0_38 = arith.constant 0 : index
    %c0_39 = arith.constant 0 : index
    %45 = vector.load %arg1[%c2, %c0_38, %c0_39] : memref<3x128x128xbf16, #tpu.memory_space<vmem>>, vector<1x128x128xbf16>
    %46 = vector.shape_cast %45 : vector<1x128x128xbf16> to vector<128x128xbf16>
    %cst_40 = arith.constant dense<0.000000e+00> : vector<8x128xf32>
    %47 = tpu.matmul %44, %46, %cst_40 {dimension_numbers = #tpu.dot_dimension_numbers<[1], [0], [0], [1], [0, 0, 1, 1], [], []>} : vector<8x128xbf16>, vector<128x128xbf16>, vector<8x128xf32> -> vector<8x128xf32>
    %c2_41 = arith.constant 2 : index
    %c0_42 = arith.constant 0 : index
    %c0_43 = arith.constant 0 : index
    %48 = vector.load %arg2[%c2_41, %c0_42, %c0_43] : memref<3x1x128xf32, #tpu.memory_space<vmem>>, vector<1x1x128xf32>
    %49 = vector.shape_cast %48 : vector<1x1x128xf32> to vector<1x128xf32>
    %50 = vector.broadcast %49 : vector<1x128xf32> to vector<8x128xf32>
    %51 = arith.addf %47, %50 : vector<8x128xf32>
    %cst_44 = arith.constant 0.000000e+00 : f32
    %52 = vector.broadcast %cst_44 : f32 to vector<8x128xf32>
    %53 = arith.maximumf %51, %52 : vector<8x128xf32>
    %54 = arith.addf %53, %34 : vector<8x128xf32>
    %c0_45 = arith.constant 0 : index
    %c0_46 = arith.constant 0 : index
    %55 = vector.load %arg5[%c0_45, %c0_46] : memref<8x128xf32, #tpu.memory_space<vmem>>, vector<8x128xf32>
    tpu.vector_store %arg5[%c0_45, %c0_46], %54 {strides = array<i32>} : memref<8x128xf32, #tpu.memory_space<vmem>>, vector<8x128xf32>,
    return
  }
}

</mosaic_0001>

<bundles_post_ra>
// kernel: tpu_custom_call.1
= control target key start
LH: loop header
LB: loop body
LE: loop exit
PB: predicated region body
PF: predicated region fallthrough
CT: control target
= control target key end

     0   :  { %10 = vsyncpa [#allocation4], 0  ;;  %s1097_s0 = inlined_call_operand.hbm [shape: f32[4,16], index: 0, kind: input, shape index: {}]   ;;  %s1098_s1 = inlined_call_operand.hbm [shape: bf16[3,128,128], index: 1, kind: input, shape index: {}]   ;;  %s1099_s2 = inlined_call_operand.vmem [shape: f32[3,1,128], index: 2, kind: input, shape index: {}]   ;;  %s1100_s3 = inlined_call_operand.hbm [shape: bf16[2,128,128], index: 3, kind: input, shape index: {}]   ;;  %s1101_s4 = inlined_call_operand.vmem [shape: f32[2,1,128], index: 4, kind: input, shape index: {}]   ;;  %s1102_s5 = inlined_call_operand.hbm [shape: f32[8,128], index: 5, kind: output, shape index: {}]  }
   0x1   :  { %11 = vsyncpa [#allocation7], 0 }
   0x2   :  { %12 = vsyncpa [#allocation5], 0  ;;  %s981_s18 = smov [#allocation6]  }
   0x3   :  { %s28_s19 = sshll.u32 %s981_s18, 4  ;;  %s29_s19 = int_to_ptr.vmem [resolvable:$true] %s28_s19 }
   0x4   :  { %s903_s20 = scalar_lea.vmem %s29_s19, 3072  ;;  %p908_p1 = scmp.lt.s32.totalorder %s29_s19, %s29_s19 }
   0x5   :  { %p904_p0 = scmp.ne.s32.totalorder %s29_s19, %s903_s20  ;;  %p909_p2 = scmp.lt.s32.totalorder %s903_s20, %s903_s20 }
   0x7   :  { %p910_p3 = por %p909_p2, %p908_p1 }
   0x9   :  { %p911_p4 = pnand %p910_p3, %p904_p0 }
   0xb   :  { %914 = shalt.err (!%p911_p4)
}
   0xc   :  { %s982_s21 = smov 64   ;;  %s983_s22 = smov 4  }
   0xd   :  { %34 = dma.hbm_to_vmem [thread:$0]  %s1098_s1, 3072, %s29_s19, [#allocation7], %s982_s21, %s982_s21, %s983_s22  }
   0xe   :  { %s984_s25 = smov [#allocation3]   ;;  %s985_s27 = smov [#allocation8]  }
   0xf   :  { %s19_s26 = sshll.u32 %s984_s25, 4  ;;  %s42_s28 = sshll.u32 %s985_s27, 4  ;;  %s20_s26 = int_to_ptr.vmem [resolvable:$true] %s19_s26  ;;  %s43_s28 = int_to_ptr.vmem [resolvable:$true] %s42_s28 }
  0x10   :  { %s923_s29 = scalar_lea.vmem %s20_s26, 64  ;;  %p928_p6 = scmp.lt.s32.totalorder %s20_s26, %s20_s26 }
  0x11   :  { %p924_p5 = scmp.ne.s32.totalorder %s20_s26, %s923_s29  ;;  %p929_p7 = scmp.lt.s32.totalorder %s923_s29, %s923_s29 }
  0x13   :  { %p930_p8 = por %p929_p7, %p928_p6 }
  0x15   :  { %p931_p9 = pnand %p930_p8, %p924_p5 }
  0x17   :  { %934 = shalt.err (!%p931_p9)
}
  0x18   :  { %22 = dma.hbm_to_vmem [thread:$0]  %s1097_s0, 64, %s20_s26, [#allocation4]  }
  0x19   :  { %s943_s7 = scalar_lea.vmem %s43_s28, 2048  ;;  %p948_p11 = scmp.lt.s32.totalorder %s43_s28, %s43_s28 }
  0x1a   :  { %p944_p10 = scmp.ne.s32.totalorder %s43_s28, %s943_s7  ;;  %p949_p12 = scmp.lt.s32.totalorder %s943_s7, %s943_s7 }
  0x1c   :  { %p950_p13 = por %p949_p12, %p948_p11 }
  0x1e   :  { %p951_p0 = pnand %p950_p13, %p944_p10 }
  0x20   :  { %954 = shalt.err (!%p951_p0)
}
  0x21   :  { %48 = dma.hbm_to_vmem [thread:$0]  %s1100_s3, 2048, %s43_s28, [#allocation7], %s982_s21, %s982_s21, %s983_s22  }
  0x22   :  { %975 = dma.done.wait [#allocation4], 64  }
  0x23   :  { %976 = vsyncadd [#allocation4], 4294967232 }
  0x24   :  { %977 = dma.done.wait [#allocation7], 5120  }
  0x25   :  { %978 = vsyncadd [#allocation7], 4294962176  ;;  %v986_v0 = vmov 0.0   ;;  %vm987_vm0 = vmmov 0   ;;  %v855_v1 = vld [vmem:[#allocation6 + $0x38] sm:$0xff]   ;;  %v856_v2 = vld [vmem:[#allocation6 + $0x30] sm:$0xff]  }
  0x26   :  { %767 = vmatprep.subr.bf16.mxu1 %v986_v0  ;;  %61 = vst [vmem:[#allocation2] sm:$0xff] %v986_v0  ;;  %783 = vmatprep.mubr.msk.bf16.mxu1 %vm987_vm0, %v986_v0  ;;  %v857_v3 = vld [vmem:[#allocation6 + $0x28] sm:$0xff]   ;;  %vm63_vm1 = vcmask 125952   ;;  %v62_v4 = vld [vmem:[#allocation3] sm:$0xf]  ;;  %v858_v6 = vld [vmem:[#allocation6 + $0x20] sm:$0xff]  }
  0x27   :  { %747 = vmatprep.subr.bf16.mxu0 %v986_v0  ;;  %763 = vmatprep.mubr.msk.bf16.mxu0 %vm987_vm0, %v986_v0  ;;  %64 = vst.msk [vmem:[#allocation2] sm:$0xf] %vm63_vm1, %v62_v4  ;;  %v863_v5 = vld [vmem:[#allocation8 + $0x38] sm:$0xff]   ;;  %v864_v7 = vld [vmem:[#allocation8 + $0x30] sm:$0xff]   ;;  %v865_v9 = vld [vmem:[#allocation8 + $0x28] sm:$0xff]   ;;  %s988_s16 = smov [#allocation9]  }
  0x28   :  { %768 = vmatpush3.bf16.msra.mxu1 %v855_v1  ;;  %748 = vmatpush3.bf16.msra.mxu0 %v863_v5  ;;  %v859_v8 = vld [vmem:[#allocation6 + $0x18] sm:$0xff]   ;;  %v860_v10 = vld [vmem:[#allocation6 + $0x10] sm:$0xff]   ;;  %v866_v11 = vld [vmem:[#allocation8 + $0x20] sm:$0xff]   ;;  %s644_s17 = sshll.u32 %s988_s16, 4  ;;  %s645_s17 = int_to_ptr.vmem [resolvable:$true] %s644_s17 }
  0x29   :  { %769 = vmatprep.subr.bf16.mxu1 %v986_v0  ;;  %749 = vmatprep.subr.bf16.mxu0 %v986_v0  ;;  %v861_v12 = vld [vmem:[#allocation6 + $0x8] sm:$0xff]   ;;  %v867_v13 = vld [vmem:[#allocation8 + $0x18] sm:$0xff]   ;;  %v862_v14 = vld [vmem:[#allocation6] sm:$0xff]   ;;  %s955_s18 = scalar_lea.vmem %s645_s17, 128  ;;  %p960_p2 = scmp.lt.s32.totalorder %s645_s17, %s645_s17 }
  0x2a   :  { %v868_v16 = vld [vmem:[#allocation8 + $0x10] sm:$0xff]   ;;  %v872_v17 = vld [vmem:[#allocation6 + $0x78] sm:$0xff]   ;;  %v869_v19 = vld [vmem:[#allocation8 + $0x8] sm:$0xff]   ;;  %p956_p1 = scmp.ne.s32.totalorder %s645_s17, %s955_s18  ;;  %p961_p3 = scmp.lt.s32.totalorder %s955_s18, %s955_s18 }
  0x2b   :  { %v874_v20 = vld [vmem:[#allocation6 + $0x70] sm:$0xff]   ;;  %v870_v21 = vld [vmem:[#allocation8] sm:$0xff]   ;;  %v876_v22 = vld [vmem:[#allocation6 + $0x68] sm:$0xff]  }
  0x2c   :  { %770 = vmatpush3.bf16.msra.mxu1 %v856_v2  ;;  %750 = vmatpush3.bf16.msra.mxu0 %v864_v7  ;;  %v871_v23 = vld [vmem:[#allocation8 + $0x78] sm:$0xff]   ;;  %v878_v24 = vld [vmem:[#allocation6 + $0x60] sm:$0xff]   ;;  %v873_v25 = vld [vmem:[#allocation8 + $0x70] sm:$0xff]   ;;  %p962_p4 = por %p961_p3, %p960_p2 }
  0x2d   :  { %771 = vmatprep.subr.bf16.mxu1 %v986_v0  ;;  %751 = vmatprep.subr.bf16.mxu0 %v986_v0  ;;  %v880_v26 = vld [vmem:[#allocation6 + $0x58] sm:$0xff]   ;;  %v875_v27 = vld [vmem:[#allocation8 + $0x68] sm:$0xff]   ;;  %v882_v28 = vld [vmem:[#allocation6 + $0x50] sm:$0xff]  }
  0x2e   :  { %v65_v15 = vld [vmem:[#allocation2] sm:$0xff]  ;;  %v877_v29 = vld [vmem:[#allocation8 + $0x60] sm:$0xff]   ;;  %v883_v32 = vld [vmem:[#allocation8 + $0x48] sm:$0xff]   ;;  %p963_p5 = pnand %p962_p4, %p956_p1 }
  0x2f   :  { %v66_v18 = vpack.c.bf16 %v65_v15, %v65_v15  ;;  %v879_v30 = vld [vmem:[#allocation8 + $0x58] sm:$0xff]   ;;  %v881_v31 = vld [vmem:[#allocation8 + $0x50] sm:$0xff]   ;;  %v884_v33 = vld [vmem:[#allocation6 + $0x48] sm:$0xff]  }
  0x30   :  { %772 = vmatpush3.bf16.msra.mxu1 %v857_v3  ;;  %752 = vmatpush3.bf16.msra.mxu0 %v865_v9  ;;  %v885_v34 = vld [vmem:[#allocation8 + $0x40] sm:$0xff]   ;;  %v663_v36 = vld [vmem:[%s1099_s2] ss:$0 sm:$0xff]  ;;  %v887_v42 = vld [vmem:[#allocation6 + $0xb8] sm:$0xff]  }
  0x31   :  { %773 = vmatprep.subr.bf16.mxu1 %v986_v0  ;;  %753 = vmatprep.subr.bf16.mxu0 %v986_v0  ;;  %v886_v35 = vld [vmem:[#allocation6 + $0x40] sm:$0xff]   ;;  %v888_v45 = vld [vmem:[#allocation6 + $0xb0] sm:$0xff]   ;;  %v889_v48 = vld [vmem:[#allocation6 + $0xa8] sm:$0xff]  }
  0x32   :  { %v890_v51 = vld [vmem:[#allocation6 + $0xa0] sm:$0xff]   ;;  %v891_v52 = vld [vmem:[#allocation6 + $0x98] sm:$0xff]   ;;  %v892_v53 = vld [vmem:[#allocation6 + $0x90] sm:$0xff]  }
  0x33   :  { %v893_v54 = vld [vmem:[#allocation6 + $0x88] sm:$0xff]   ;;  %v894_v55 = vld [vmem:[#allocation6 + $0x80] sm:$0xff]   ;;  %v654_v56 = vld [vmem:[%s1101_s4] ss:$0 sm:$0xff] }
  0x34   :  { %774 = vmatpush3.bf16.msra.mxu1 %v858_v6  ;;  %754 = vmatpush3.bf16.msra.mxu0 %v866_v11  ;;  %v673_v58 = vld [vmem:[%s1101_s4 + $0x1] ss:$0 sm:$0xff]  ;;  %v693_v11 = vld [vmem:[%s1099_s2 + $0x2] ss:$0 sm:$0xff] }
  0x35   :  { %775 = vmatprep.subr.bf16.mxu1 %v986_v0  ;;  %755 = vmatprep.subr.bf16.mxu0 %v986_v0  ;;  %v683_v59 = vld [vmem:[%s1099_s2 + $0x1] ss:$0 sm:$0xff] }
  0x38   :  { %776 = vmatpush3.bf16.msra.mxu1 %v859_v8  ;;  %756 = vmatpush3.bf16.msra.mxu0 %v867_v13 }
  0x39   :  { %777 = vmatprep.subr.bf16.mxu1 %v986_v0  ;;  %757 = vmatprep.subr.bf16.mxu0 %v986_v0 }
  0x3c   :  { %778 = vmatpush3.bf16.msra.mxu1 %v860_v10  ;;  %758 = vmatpush3.bf16.msra.mxu0 %v868_v16 }
  0x3d   :  { %779 = vmatprep.subr.bf16.mxu1 %v986_v0  ;;  %759 = vmatprep.subr.bf16.mxu0 %v986_v0 }
  0x40   :  { %780 = vmatpush3.bf16.msra.mxu1 %v861_v12  ;;  %760 = vmatpush3.bf16.msra.mxu0 %v869_v19 }
  0x41   :  { %781 = vmatprep.subr.bf16.mxu1 %v986_v0  ;;  %761 = vmatprep.subr.bf16.mxu0 %v986_v0 }
  0x44   :  { %782 = vmatpush3.bf16.msra.mxu1 %v862_v14  ;;  %762 = vmatpush3.bf16.msra.mxu0 %v870_v21 }
  0x45   :  { %807 = vmatprep.subr.bf16.mxu1 %v986_v0  ;;  %787 = vmatprep.subr.bf16.mxu0 %v986_v0 }
  0x47   :  { %784 = vmatmul.mubr.bf16.vlgmr.msra.gmra.mxu1 %v66_v18  ;;  %764 = vmatmul.mubr.bf16.vlgmr.msra.gmra.mxu0 %v66_v18 }
  0x48   :  { %808 = vmatpush3.bf16.msra.mxu1 %v872_v17  ;;  %823 = vmatprep.mubr.msk.bf16.mxu1 %vm987_vm0, %v986_v0 }
  0x49   :  { %809 = vmatprep.subr.bf16.mxu1 %v986_v0  ;;  %788 = vmatpush3.bf16.msra.mxu0 %v871_v23 }
  0x4a   :  { %789 = vmatprep.subr.bf16.mxu0 %v986_v0  ;;  %803 = vmatprep.mubr.msk.bf16.mxu0 %vm987_vm0, %v986_v0 }
  0x4c   :  { %810 = vmatpush3.bf16.msra.mxu1 %v874_v20 }
  0x4d   :  { %811 = vmatprep.subr.bf16.mxu1 %v986_v0  ;;  %790 = vmatpush3.bf16.msra.mxu0 %v873_v25 }
  0x4e   :  { %791 = vmatprep.subr.bf16.mxu0 %v986_v0 }
  0x50   :  { %812 = vmatpush3.bf16.msra.mxu1 %v876_v22 }
  0x51   :  { %813 = vmatprep.subr.bf16.mxu1 %v986_v0  ;;  %792 = vmatpush3.bf16.msra.mxu0 %v875_v27 }
  0x52   :  { %793 = vmatprep.subr.bf16.mxu0 %v986_v0 }
  0x54   :  { %814 = vmatpush3.bf16.msra.mxu1 %v878_v24 }
  0x55   :  { %815 = vmatprep.subr.bf16.mxu1 %v986_v0  ;;  %794 = vmatpush3.bf16.msra.mxu0 %v877_v29 }
  0x56   :  { %795 = vmatprep.subr.bf16.mxu0 %v986_v0 }
  0x58   :  { %816 = vmatpush3.bf16.msra.mxu1 %v880_v26 }
  0x59   :  { %817 = vmatprep.subr.bf16.mxu1 %v986_v0  ;;  %796 = vmatpush3.bf16.msra.mxu0 %v879_v30 }
  0x5a   :  { %797 = vmatprep.subr.bf16.mxu0 %v986_v0 }
  0x5c   :  { %818 = vmatpush3.bf16.msra.mxu1 %v882_v28 }
  0x5d   :  { %819 = vmatprep.subr.bf16.mxu1 %v986_v0  ;;  %798 = vmatpush3.bf16.msra.mxu0 %v881_v31 }
  0x5e   :  { %799 = vmatprep.subr.bf16.mxu0 %v986_v0 }
  0x60   :  { %820 = vmatpush3.bf16.msra.mxu1 %v884_v33 }
  0x61   :  { %800 = vmatpush3.bf16.msra.mxu0 %v883_v32  ;;  %821 = vmatprep.subr.bf16.mxu1 %v986_v0 }
  0x62   :  { %801 = vmatprep.subr.bf16.mxu0 %v986_v0 }
  0x64   :  { %822 = vmatpush3.bf16.msra.mxu1 %v886_v35 }
  0x65   :  { %802 = vmatpush3.bf16.msra.mxu0 %v885_v34 }
  0x66   :  { %827 = vmatprep.subr.bf16.mxu0 %v986_v0 }
 0x107   :  { %v284_v37 = vpop.f32.mrf.mxu1  ;;  %v172_v46 = vpop.f32.mrf.mxu0 }
 0x108   :  { %v285_v38 = vadd.f32 %v663_v36, %v284_v37  ;;  %v173_v57 = vadd.f32 %v654_v56, %v172_v46 }
 0x109   :  { %v785_v39 = vpop.f32.mrf.mxu1  ;;  %v765_v47 = vpop.f32.mrf.mxu0 }
 0x10a   :  { %v290_v40 = vmax.f32 %v285_v38, 0.0  ;;  %v178_v62 = vmax.f32 %v173_v57, 0.0 }
 0x10b   :  { %v287_v41 = vpop.f32.mrf.mxu1  ;;  %v175_v49 = vpop.f32.mrf.mxu0 }
 0x10c   :  { %v291_v43 = vpack.c.bf16 %v290_v40, %v290_v40 }
 0x10d   :  { %v786_v44 = vpop.f32.mrf.mxu1  ;;  %v766_v50 = vpop.f32.mrf.mxu0 }
 0x10e   :  { %804 = vmatmul.mubr.bf16.vlgmr.msra.gmra.mxu0 %v291_v43  ;;  %824 = vmatmul.mubr.bf16.vlgmr.msra.gmra.mxu1 %v291_v43 }
 0x10f   :  { %828 = vmatpush3.bf16.msra.mxu0 %v887_v42  ;;  %843 = vmatprep.mubr.msk.bf16.mxu0 %vm987_vm0, %v986_v0 }
 0x110   :  { %829 = vmatprep.subr.bf16.mxu0 %v986_v0 }
 0x113   :  { %830 = vmatpush3.bf16.msra.mxu0 %v888_v45 }
 0x114   :  { %831 = vmatprep.subr.bf16.mxu0 %v986_v0 }
 0x117   :  { %832 = vmatpush3.bf16.msra.mxu0 %v889_v48 }
 0x118   :  { %833 = vmatprep.subr.bf16.mxu0 %v986_v0 }
 0x11b   :  { %834 = vmatpush3.bf16.msra.mxu0 %v890_v51 }
 0x11c   :  { %835 = vmatprep.subr.bf16.mxu0 %v986_v0 }
 0x11f   :  { %836 = vmatpush3.bf16.msra.mxu0 %v891_v52 }
 0x120   :  { %837 = vmatprep.subr.bf16.mxu0 %v986_v0 }
 0x123   :  { %838 = vmatpush3.bf16.msra.mxu0 %v892_v53 }
 0x124   :  { %839 = vmatprep.subr.bf16.mxu0 %v986_v0 }
 0x127   :  { %840 = vmatpush3.bf16.msra.mxu0 %v893_v54 }
 0x128   :  { %841 = vmatprep.subr.bf16.mxu0 %v986_v0 }
 0x12b   :  { %842 = vmatpush3.bf16.msra.mxu0 %v894_v55 }
 0x1ce   :  { %v399_v60 = vpop.f32.mrf.mxu0  ;;  %v514_v61 = vpop.f32.mrf.mxu1 }
 0x1cf   :  { %v400_v63 = vadd.f32 %v673_v58, %v399_v60  ;;  %v515_v0 = vadd.f32 %v683_v59, %v514_v61 }
 0x1d0   :  { %v805_v1 = vpop.f32.mrf.mxu0  ;;  %v825_v2 = vpop.f32.mrf.mxu1 }
 0x1d1   :  { %v405_v3 = vmax.f32 %v400_v63, 0.0  ;;  %v520_v4 = vmax.f32 %v515_v0, 0.0 }
 0x1d2   :  { %v402_v5 = vpop.f32.mrf.mxu0  ;;  %v517_v6 = vpop.f32.mrf.mxu1 }
 0x1d3   :  { %v406_v7 = vadd.f32 %v405_v3, %v178_v62  ;;  %v521_v8 = vpack.c.bf16 %v520_v4, %v520_v4 }
 0x1d4   :  { %v806_v9 = vpop.f32.mrf.mxu0  ;;  %v826_v10 = vpop.f32.mrf.mxu1 }
 0x1d5   :  { %844 = vmatmul.mubr.bf16.vlgmr.msra.gmra.mxu0 %v521_v8 }
 0x295   :  { %v629_v12 = vpop.f32.mrf.mxu0 }
 0x296   :  { %v630_v13 = vadd.f32 %v693_v11, %v629_v12 }
 0x297   :  { %v845_v14 = vpop.f32.mrf.mxu0 }
 0x298   :  { %v635_v15 = vmax.f32 %v630_v13, 0.0 }
 0x299   :  { %v632_v16 = vpop.f32.mrf.mxu0 }
 0x29a   :  { %v636_v17 = vadd.f32 %v635_v15, %v406_v7 }
 0x29b   :  { %v846_v18 = vpop.f32.mrf.mxu0 }
 0x29c   :  { %637 = vst [vmem:[#allocation9] sm:$0xff] %v636_v17 }
 0x29d   :  { %966 = shalt.err (!%p963_p5)
}
 0x29e   :  { %647 = dma.vmem_to_hbm [thread:$0]  %s645_s17, 128, %s1102_s5, [#allocation5]  }
 0x29f   :  { %979 = dma.done.wait [#allocation5], 128  }
 0x2a0   :  { %980 = vsyncadd [#allocation5], 4294967168 }
 0x2a1   :  { %651 = vsyncpa [#allocation4], 1 }
 0x2a2   :  { %652 = vsyncpa [#allocation7], 1 }
 0x2a3   :  { %653 = vsyncpa [#allocation5], 1 }

</bundles_post_ra>
